<compile_context>
chip_gen: v7x
topology: tpu7x:2x2x1
jax: 0.10.0
libtpu: 0.0.40
codegen_flags: <defaults>
</compile_context>

<pallas_src>
import functools

import jax
import jax.numpy as jnp
from jax.experimental import pallas as pl
from jax.experimental.pallas import tpu as pltpu


def _round_up(x, m):
    return ((x + m - 1) // m) * m


def _spcl_loss_kernel(thr_ref, prob_ref, labels_ref, scores_ref,
                      loss_ref, take_ref, *, n_total):
    tn, c = prob_ref.shape
    prob = prob_ref[...]                                   # (TILE_N, C) native dtype
    labels = labels_ref[...]                               # (TILE_N, 1) int32
    scores = scores_ref[...].astype(jnp.float32)           # (TILE_N, 1)
    thr = thr_ref[0, 0]                                    # SMEM scalar (f32)

    # Row-validity mask for the (possibly ragged) last tile: rows past the true
    # N hold unspecified VMEM data and must be select-masked out.
    row_start = pl.program_id(0) * tn
    row_ids = jax.lax.broadcasted_iota(jnp.int32, (tn, 1), 0) + row_start
    row_valid = row_ids < n_total                          # (TILE_N, 1) bool

    # difficulty_i = -prob[i, labels[i]] via lane-iota compare + select in the
    # native dtype; the lane reduce is exact (exactly one nonzero per row), so
    # only the (TILE_N, 1) result gets cast to f32.
    col_ids = jax.lax.broadcasted_iota(jnp.int32, (tn, c), 1)
    hit = col_ids == labels                                # (TILE_N, C) bool
    picked = jnp.where(hit, prob, 0)                       # native-dtype select
    difficulty = -jnp.sum(picked, axis=1, keepdims=True).astype(jnp.float32)

    # Self-paced mask v = (scores < threshold), gated by row validity.
    v = (row_valid & (scores < thr)).astype(jnp.float32)   # (TILE_N, 1)

    # Select (not multiply) on row validity so garbage difficulty in padded
    # rows can never contaminate the partial sum.  For VALID rows the
    # reference's `difficulty * v` multiply is kept exactly (faithful to
    # PyTorch, including its inf*0 hazard when a log-prob hits -inf).
    contrib = jnp.where(row_valid, difficulty * v, 0.0)    # (TILE_N, 1)

    loss_ref[...] = jnp.sum(contrib, keepdims=True)              # (1, 1) f32
    # Exact: per-tile count <= TILE_N << 2^24, so the f32 sum of 0/1 is exact.
    take_ref[...] = jnp.sum(v, keepdims=True).astype(jnp.int32)  # (1, 1) i32


def dialog_spcl_loss(prob, labels, scores, threshold, *, tile_n=None):
    """Returns (mean_loss, take_samp), matching
    DialogSPCLLoss.forward(prob, labels, scores, return_take_samp=True)."""
    n, c = prob.shape
    itemsize = jnp.dtype(prob.dtype).itemsize

    # ---- generation-aware VMEM budget -------------------------------------
    try:
        vmem_cap = int(pltpu.get_tpu_info().vmem_capacity_bytes)
    except Exception:
        vmem_cap = 64 << 20                        # conservative (v7x-sized)
    if vmem_cap >= (100 << 20):                    # v5e / v6e: 128 MiB physical
        work_budget, vmem_limit = 48 << 20, 80 << 20
    else:                                          # v7x: 64 MiB per TensorCore
        work_budget, vmem_limit = 20 << 20, 40 << 20

    if tile_n is None:
        # Double-buffered VMEM bytes per tile row: the (TILE_N, C) prob block
        # plus the 128-lane padding of the (TILE_N, 1) labels / scores blocks
        # (the padding is VMEM-only; the HBM side stays compact).
        c_pad = _round_up(c, 128)
        bytes_per_row = 2 * c_pad * itemsize + 2 * 2 * 128 * 4
        budget_rows = max(8, (work_budget // bytes_per_row) // 8 * 8)
        # Keep >= 4 grid steps when N allows it so the "parallel" row axis can
        # shard across both TensorCores on v7x.
        quarter_rows = _round_up(max(1, -(-n // 4)), 8)
        tile_n = max(8, min(budget_rows, quarter_rows))
    else:
        tile_n = max(8, (int(tile_n) // 8) * 8)    # sublane multiple

    num_tiles = -(-n // tile_n)                    # ragged last tile is masked in-kernel
    # TODO(synk): for very large C (>~100K classes) switch to a scalar-prefetch
    # per-row gather (fetch only the 128-lane chunk containing labels[i]); for
    # tiny C (<128) fold 128//C rows into one lane-dense sublane row.

    labels_2d = labels.reshape(n, 1).astype(jnp.int32)
    scores_2d = scores.reshape(n, 1)
    thr_smem = jnp.asarray(threshold, dtype=jnp.float32).reshape(1, 1)

    kernel = functools.partial(_spcl_loss_kernel, n_total=n)

    cost = pl.CostEstimate(
        flops=3 * n * c,
        transcendentals=0,
        bytes_accessed=(n * c * itemsize
                        + n * (4 + jnp.dtype(scores_2d.dtype).itemsize)
                        + num_tiles * 8 + 4),
    )

    loss_parts, take_parts = pl.pallas_call(
        kernel,
        grid=(num_tiles,),
        in_specs=[
            pl.BlockSpec(memory_space=pltpu.MemorySpace.SMEM),   # threshold (1,1)
            pl.BlockSpec((tile_n, c), lambda i: (i, 0)),         # prob tile
            pl.BlockSpec((tile_n, 1), lambda i: (i, 0)),         # labels column
            pl.BlockSpec((tile_n, 1), lambda i: (i, 0)),         # scores column
        ],
        out_specs=(
            # (None, 1, 1): leading dim squeezed -> kernel sees a (1, 1) ref.
            pl.BlockSpec((None, 1, 1), lambda i: (i, 0, 0)),     # per-tile loss sum
            pl.BlockSpec((None, 1, 1), lambda i: (i, 0, 0)),     # per-tile take count
        ),
        out_shape=(
            jax.ShapeDtypeStruct((num_tiles, 1, 1), jnp.float32),
            jax.ShapeDtypeStruct((num_tiles, 1, 1), jnp.int32),
        ),
        compiler_params=pltpu.CompilerParams(
            dimension_semantics=("parallel",),
            vmem_limit_bytes=vmem_limit,
        ),
        cost_estimate=cost,
    )(thr_smem, prob, labels_2d, scores_2d)

    # Tiny final reduction in plain JAX; divide by the TRUE sample count
    # (loss.mean() in the reference), never the padded count.
    loss = jnp.sum(loss_parts) / jnp.float32(n)
    take = jnp.sum(take_parts)
    return loss, take


def _reference(prob, labels, scores, threshold):
    """Plain-JAX reference mirroring the PyTorch forward."""
    difficulty = -jnp.take_along_axis(prob, labels[:, None], axis=1)[:, 0]
    v = (scores < threshold).astype(jnp.int32)
    take_samp = jnp.sum(v)
    loss = difficulty * v.astype(prob.dtype)
    return jnp.mean(loss), take_samp


if __name__ == "__main__":
    key = jax.random.PRNGKey(0)

    # Module "params" set deterministically in-script.  self.v and
    # growing_factor only affect training-loop state (increase_threshold),
    # not the forward pass, so they are not needed here.
    n_class = 32

    # Configs: (n_sample, threshold, tile_n)
    #   (24, 0.5, 8)    -> exact multi-tile path
    #   (27, 0.3, 8)    -> ragged last tile (3 valid rows) + different threshold
    #   (27, 0.5, None) -> automatic tile derivation
    for idx, (n_sample, threshold, tile_n) in enumerate(
            [(24, 0.5, 8), (27, 0.3, 8), (27, 0.5, None)]):
        k1, k2, k3 = jax.random.split(jax.random.fold_in(key, idx), 3)
        logits = jax.random.normal(k1, (n_sample, n_class), dtype=jnp.float32)
        prob = jax.nn.log_softmax(logits, axis=-1)           # log-probabilities
        labels = jax.random.randint(k2, (n_sample,), 0, n_class, dtype=jnp.int32)
        scores = jax.random.uniform(k3, (n_sample,), dtype=jnp.float32)

        loss, take_samp = dialog_spcl_loss(prob, labels, scores, threshold,
                                           tile_n=tile_n)
        jax.block_until_ready((loss, take_samp))

        ref_loss, ref_take = _reference(prob, labels, scores, threshold)
        assert jnp.allclose(loss, ref_loss, atol=1e-5, rtol=1e-5), (loss, ref_loss)
        assert int(take_samp) == int(ref_take), (take_samp, ref_take)

    print("KERNEL_OK")
</pallas_src>

<mosaic_0001>
module attributes {stable_mosaic.version = 11 : i64} {
  func.func @_spcl_loss_kernel(%arg0: i32, %arg1: memref<1x1xf32, #tpu.memory_space<smem>>, %arg2: memref<8x32xf32, #tpu.memory_space<vmem>>, %arg3: memref<8x1xi32, #tpu.memory_space<vmem>>, %arg4: memref<8x1xf32, #tpu.memory_space<vmem>>, %arg5: memref<1x1x1xf32, #tpu.memory_space<vmem>>, %arg6: memref<1x1x1xi32, #tpu.memory_space<vmem>>) attributes {dimension_semantics = [#tpu.dimension_semantics<parallel>], iteration_bounds = array<i64: 3>, scalar_prefetch = 0 : i64, scratch_operands = 0 : i64, tpu.core_type = #tpu.core_type<tc>, window_params = [{transform_indices = @transform_0, window_bounds = array<i64: 1, 1>}, {transform_indices = @transform_1, window_bounds = array<i64: 8, 32>}, {transform_indices = @transform_2, window_bounds = array<i64: 8, 1>}, {transform_indices = @transform_3, window_bounds = array<i64: 8, 1>}, {transform_indices = @transform_4, window_bounds = array<i64: 1, 1, 1>}, {transform_indices = @transform_5, window_bounds = array<i64: 1, 1, 1>}]} {
    %c0 = arith.constant 0 : index
    %c0_0 = arith.constant 0 : index
    %0 = vector.load %arg2[%c0, %c0_0] : memref<8x32xf32, #tpu.memory_space<vmem>>, vector<8x32xf32>
    %c0_1 = arith.constant 0 : index
    %c0_2 = arith.constant 0 : index
    %1 = vector.load %arg3[%c0_1, %c0_2] : memref<8x1xi32, #tpu.memory_space<vmem>>, vector<8x1xi32>
    %c0_3 = arith.constant 0 : index
    %c0_4 = arith.constant 0 : index
    %2 = vector.load %arg4[%c0_3, %c0_4] : memref<8x1xf32, #tpu.memory_space<vmem>>, vector<8x1xf32>
    %c0_5 = arith.constant 0 : index
    %c0_6 = arith.constant 0 : index
    %3 = memref.load %arg1[%c0_5, %c0_6] : memref<1x1xf32, #tpu.memory_space<smem>>
    %c8_i32 = arith.constant 8 : i32
    %4 = arith.muli %arg0, %c8_i32 : i32
    %5 = tpu.iota {dimensions = array<i32: 0>} : vector<8x1xi32>
    %6 = vector.broadcast %4 : i32 to vector<8x1xi32>
    %7 = arith.addi %5, %6 : vector<8x1xi32>
    %c24_i32 = arith.constant 24 : i32
    %8 = vector.broadcast %c24_i32 : i32 to vector<8x1xi32>
    %9 = arith.cmpi slt, %7, %8 : vector<8x1xi32>
    %10 = tpu.iota {dimensions = array<i32: 1>} : vector<8x32xi32>
    %11 = vector.broadcast %1 : vector<8x1xi32> to vector<8x32xi32>
    %12 = arith.cmpi eq, %10, %11 : vector<8x32xi32>
    %c0_i32 = arith.constant 0 : i32
    %13 = arith.sitofp %c0_i32 : i32 to f32
    %14 = vector.broadcast %13 : f32 to vector<8x32xf32>
    %15 = arith.select %12, %0, %14 : vector<8x32xi1>, vector<8x32xf32>
    %cst = arith.constant dense<0.000000e+00> : vector<8xf32>
    %16 = vector.multi_reduction <add>, %15, %cst [1] : vector<8x32xf32> to vector<8xf32>
    %17 = vector.shape_cast %16 : vector<8xf32> to vector<8x1xf32>
    %cst_7 = arith.constant 0.000000e+00 : f32
    %18 = vector.broadcast %cst_7 : f32 to vector<8x1xf32>
    %19 = arith.subf %18, %17 : vector<8x1xf32>
    %20 = vector.broadcast %3 : f32 to vector<8x1xf32>
    %21 = arith.cmpf olt, %2, %20 : vector<8x1xf32>
    %22 = arith.andi %9, %21 : vector<8x1xi1>
    %23 = arith.extui %22 : vector<8x1xi1> to vector<8x1xi32>
    %24 = arith.sitofp %23 : vector<8x1xi32> to vector<8x1xf32>
    %25 = arith.mulf %19, %24 : vector<8x1xf32>
    %cst_8 = arith.constant 0.000000e+00 : f32
    %26 = vector.broadcast %cst_8 : f32 to vector<8x1xf32>
    %27 = arith.select %9, %25, %26 : vector<8x1xi1>, vector<8x1xf32>
    %28 = vector.shape_cast %27 : vector<8x1xf32> to vector<1x8x1xf32>
    %cst_9 = arith.constant dense<0.000000e+00> : vector<1xf32>
    %29 = vector.multi_reduction <add>, %28, %cst_9 [1, 2] : vector<1x8x1xf32> to vector<1xf32>
    %30 = vector.shape_cast %29 : vector<1xf32> to vector<1x1x1xf32>
    %31 = vector.extract %30[0, 0, 0] : f32 from vector<1x1x1xf32>
    %32 = vector.broadcast %31 : f32 to vector<1x1xf32>
    %c0_10 = arith.constant 0 : index
    %c0_11 = arith.constant 0 : index
    %c0_12 = arith.constant 0 : index
    %33 = vector.load %arg5[%c0_10, %c0_11, %c0_12] : memref<1x1x1xf32, #tpu.memory_space<vmem>>, vector<1x1x1xf32>
    %34 = vector.shape_cast %33 : vector<1x1x1xf32> to vector<1x1xf32>
    %35 = vector.shape_cast %32 : vector<1x1xf32> to vector<1x1x1xf32>
    tpu.vector_store %arg5[%c0_10, %c0_11, %c0_12], %35 {strides = array<i32>} : memref<1x1x1xf32, #tpu.memory_space<vmem>>, vector<1x1x1xf32>,
    %36 = vector.shape_cast %24 : vector<8x1xf32> to vector<1x8x1xf32>
    %cst_13 = arith.constant dense<0.000000e+00> : vector<1xf32>
    %37 = vector.multi_reduction <add>, %36, %cst_13 [1, 2] : vector<1x8x1xf32> to vector<1xf32>
    %38 = vector.shape_cast %37 : vector<1xf32> to vector<1x1x1xf32>
    %39 = vector.extract %38[0, 0, 0] : f32 from vector<1x1x1xf32>
    %40 = vector.broadcast %39 : f32 to vector<1x1xf32>
    %41 = arith.fptosi %40 : vector<1x1xf32> to vector<1x1xi32>
    %c0_14 = arith.constant 0 : index
    %c0_15 = arith.constant 0 : index
    %c0_16 = arith.constant 0 : index
    %42 = vector.load %arg6[%c0_14, %c0_15, %c0_16] : memref<1x1x1xi32, #tpu.memory_space<vmem>>, vector<1x1x1xi32>
    %43 = vector.shape_cast %42 : vector<1x1x1xi32> to vector<1x1xi32>
    %44 = vector.shape_cast %41 : vector<1x1xi32> to vector<1x1x1xi32>
    tpu.vector_store %arg6[%c0_14, %c0_15, %c0_16], %44 {strides = array<i32>} : memref<1x1x1xi32, #tpu.memory_space<vmem>>, vector<1x1x1xi32>,
    return
  }
  func.func @transform_0(%arg0: i32) -> (i32, i32) {
    %c0_i32 = arith.constant 0 : i32
    %c0_i32_0 = arith.constant 0 : i32
    %c0_i32_1 = arith.constant 0 : i32
    return %c0_i32, %c0_i32_0 : i32, i32
  }
  func.func @transform_1(%arg0: i32) -> (i32, i32) {
    %c0_i32 = arith.constant 0 : i32
    %c0_i32_0 = arith.constant 0 : i32
    return %arg0, %c0_i32 : i32, i32
  }
  func.func @transform_2(%arg0: i32) -> (i32, i32) {
    %c0_i32 = arith.constant 0 : i32
    %c0_i32_0 = arith.constant 0 : i32
    return %arg0, %c0_i32 : i32, i32
  }
  func.func @transform_3(%arg0: i32) -> (i32, i32) {
    %c0_i32 = arith.constant 0 : i32
    %c0_i32_0 = arith.constant 0 : i32
    return %arg0, %c0_i32 : i32, i32
  }
  func.func @transform_4(%arg0: i32) -> (i32, i32, i32) {
    %c0_i32 = arith.constant 0 : i32
    %c0_i32_0 = arith.constant 0 : i32
    %c0_i32_1 = arith.constant 0 : i32
    return %arg0, %c0_i32, %c0_i32_0 : i32, i32, i32
  }
  func.func @transform_5(%arg0: i32) -> (i32, i32, i32) {
    %c0_i32 = arith.constant 0 : i32
    %c0_i32_0 = arith.constant 0 : i32
    %c0_i32_1 = arith.constant 0 : i32
    return %arg0, %c0_i32, %c0_i32_0 : i32, i32, i32
  }
}

</mosaic_0001>

<bundles_post_ra>
// kernel: tpu_custom_call.1
= control target key start
LH: loop header
LB: loop body
LE: loop exit
PB: predicated region body
PF: predicated region fallthrough
CT: control target
= control target key end

     0   :  { %s486_s20 = smov 0   ;;  %s519_s0 = inlined_call_operand.<no memory space> [shape: f32[1,1], index: 0, kind: input, shape index: {}]   ;;  %s520_s1 = inlined_call_operand.vmem [shape: f32[24,32], index: 1, kind: input, shape index: {}]   ;;  %s521_s2 = inlined_call_operand.vmem [shape: s32[24,1], index: 2, kind: input, shape index: {}]   ;;  %s522_s3 = inlined_call_operand.vmem [shape: f32[24,1], index: 3, kind: input, shape index: {}]   ;;  %s523_s4 = inlined_call_operand.vmem [shape: f32[3,1,1], index: 4, kind: output, shape index: {0}]   ;;  %s524_s5 = inlined_call_operand.vmem [shape: s32[3,1,1], index: 5, kind: output, shape index: {1}]  }
   0x1   :  { %11 = sst [smem:[#allocation2]] %s519_s0 }
   0x2 LB: > { %s414_s21 = sadd.s32 4294967295, %s449_s20   ;;  %p418_p0 = scmp.ge.s32.totalorder %s449_s20, 1  ;;  %s449_s20 = sphi %s486_s20, %s17_s20  }
   0x3   : > { %p208_p1 = scmp.lt.s32.totalorder %s449_s20, 4 }
   0x5   : > { %p209_p2 = pnand %p418_p0, %p208_p1 }
   0x6   : > { %p244_p3 = scmp.lt.s32.totalorder (!%p209_p2), %s414_s21, 2  ;;  %v451_v0 = vmov (!%p209_p2), 0   ;;  %v267_v2 = vlaneseq (!%p209_p2)  ;;  %s265_s26 = sld [smem:[#allocation2]] (!%p209_p2)  ;;  %vm279_vm3 = vcmask (!%p209_p2), 261120   ;;  %v452_v13 = vmov (!%p209_p2), 0.0  }
   0x7   : > { %212 = sbr.rel (%p209_p2) target bundleno = 512 (0x200), region = 36  ;;  %442 = vset.pattern.permute.xlu0 (!%p209_p2), %v451_v0  ;;  %s422_s27 = sshll.u32 (!%p209_p2), %s414_s21, 3  ;;  %vm291_vm5 = vcmask (!%p209_p2), 7168   ;;  %vm303_vm6 = vcmask (!%p209_p2), 0  }
   0x8   : > { %v268_v3 = vshrl.u32 (!%p209_p2), %v267_v2, 7  ;;  %v269_v4 = vstv (!%p209_p2), %s422_s27  ;;  %v273_v8 = vand.u32 (!%p209_p2), 127, %v267_v2 }
   0xa   : > { %v270_v5 = vadd.s32 (!%p209_p2), %v269_v4, %v268_v3 }
   0xc   : > { %vm271_vm0 = vcmp.lt.s32.totalorder (!%p209_p2), %v270_v5, 24  ;;  %v284_v7 = vstv (!%p209_p2), %s265_s26 }
   0xe   : > { %s494_s22 = scalar_select %p244_p3, %s414_s21, 2 }
  0x10   : > { %s419_s0 = sshll.u32 %s494_s22, 3  ;;  %s258_s11 = scalar_lea.vmem %s523_s4, %s494_s22 }
  0x11   : > { %s251_s25 = scalar_lea.vmem %s521_s2, %s419_s0  ;;  %s255_s30 = scalar_lea.vmem %s522_s3, %s419_s0 }
  0x12   : > { %v263_v1 = vld [vmem:[%s251_s25] sm:$0xff]  ;;  %s247_s8 = scalar_lea.vmem %s520_s1, %s419_s0  ;;  %s261_s16 = scalar_lea.vmem %s524_s5, %s494_s22 }
  0x13   : > { %275 = vperm.xlu0 %442, %v263_v1   ;;  %v264_v6 = vld [vmem:[%s255_s30] sm:$0xff] }
  0x14   : > { %vm285_vm1 = vcmp.lt.f32.partialorder %v264_v6, %v284_v7  ;;  %v262_v9 = vld [vmem:[%s247_s8] sm:$0xff] }
  0x15   : > { %vm286_vm2 = vmand %vm271_vm0, %vm285_vm1 }
  0x16   : > { %v423_v14 = vsel %vm286_vm2, 1.0, %v452_v13 }
  0x17   : > { %v305_v20 = vsel %vm291_vm5, %v423_v14, 0.0 }
  0x92   : > { %v276_v10 = vpop.permute.xlu0 %275 }
  0x93   : > { %vm277_vm4 = vcmp.eq.s32.totalorder %v273_v8, %v276_v10 }
  0x94   : > { %v278_v11 = vsel %vm277_vm4, %v262_v9, 0.0 }
  0x95   : > { %v280_v12 = vsel %vm279_vm3, %v278_v11, 0.0 }
  0x96   : > { %281 = vadd.xlane.f32.xlu0 %v280_v12 }
 0x123   : > { %v282_v15 = vpop.xlane.xlu0 %281 }
 0x124   : > { %v283_v16 = vsub.f32 0.0, %v282_v15 }
 0x126   : > { %v289_v17 = vmul.f32 %v423_v14, %v283_v16 }
 0x128   : > { %v290_v18 = vsel %vm271_vm0, %v289_v17, 0.0 }
 0x129   : > { %v292_v19 = vsel %vm291_vm5, %v290_v18, 0.0 }
 0x12a   : > { %293 = vadd.xlane.f32.xlu1 %v292_v19 }
 0x12e   : > { %306 = vadd.xlane.f32.xlu1 %v305_v20 }
 0x1b7   : > { %v294_v21 = vpop.xlane.xlu1 %293 }
 0x1b8   : > { %v295_v22 = vrot.slane %v294_v21, 4 }
 0x1ba   : > { %v296_v23 = vadd.f32 %v295_v22, %v294_v21 }
 0x1bb   : > { %v307_v24 = vpop.xlane.xlu1 %306 }
 0x1bc   : > { %v297_v25 = vrot.slane %v296_v23, 2  ;;  %v308_v26 = vrot.slane %v307_v24, 4 }
 0x1be   : > { %v309_v27 = vadd.f32 %v308_v26, %v307_v24  ;;  %v298_v28 = vadd.f32 %v297_v25, %v296_v23 }
 0x1c0   : > { %v310_v29 = vrot.slane %v309_v27, 2  ;;  %v299_v30 = vrot.slane %v298_v28, 1 }
 0x1c2   : > { %v311_v31 = vadd.f32 %v310_v29, %v309_v27  ;;  %v300_v32 = vadd.f32 %v299_v30, %v298_v28 }
 0x1c4   : > { %426 = vpush %v300_v32  ;;  %v312_v33 = vrot.slane %v311_v31, 1 }
 0x1c6   : > { %v313_v34 = vadd.f32 %v312_v33, %v311_v31 }
 0x1c8   : > { %428 = vpush %v313_v34 }
 0x1f5   : > { %s427_s12 = spop %426 }
 0x1f6   : > { %v302_v35 = vstv %s427_s12 }
 0x1f7   : > { %304 = vst.msk [vmem:[%s258_s11] sm:$0x1] %vm303_vm6, %v302_v35 }
 0x1f9   : > { %s429_s13 = spop %428 }
 0x1fa   : > { %v315_v36 = vstv %s429_s13 }
 0x1fb   : > { %v430_v37 = vtrunc.f32 %v315_v36 }
 0x1fd   : > { %v431_v38 = vcvt.f32.s32 %v430_v37 }
 0x1ff   : > { %317 = vst.msk [vmem:[%s261_s16] sm:$0x1] %vm303_vm6, %v431_v38 }
 0x200 PF: > { %s17_s20 = sadd.s32 1, %s449_s20  }
 0x201   : > { %p14_p4 = scmp.ge.s32.totalorder %s17_s20, 5  }
 0x203   :  { %16 = sbr.rel (!%p14_p4) target bundleno = 2 (0x2), region = 84 }

</bundles_post_ra>
